<compile_context>
chip_gen: v7x
topology: tpu7x:2x2x1
jax: 0.10.0
libtpu: 0.0.40
codegen_flags: <defaults>
</compile_context>

<pallas_src>
import jax
import jax.numpy as jnp
from jax.experimental import pallas as pl
from jax.experimental.pallas import tpu as pltpu
from math import sqrt

# ---- small, module-consistent hyperparameters -------------------------------
B = 2          # batch
T = 8          # max_time (encoder timesteps)
D_LSTM = 32    # decoder_lstm_units
A_DIM = 32     # attention_dim
N_FILT = 8     # attention_filters
KSIZE = 3      # attention_kernel (odd)
EMB = 16       # embedding_dim
SPK = 8        # hps.speaker_embedding_size
E_DIM = EMB + SPK
PAD = (KSIZE - 1) // 2
LOC_COLS = 2 * KSIZE            # im2col width (channels x taps) = 6
W_ROWS = LOC_COLS + D_LSTM      # rows of the fused matmul RHS = 38


# ---- Pallas kernel: the whole attention forward hot path --------------------
def attention_kernel(q_ref, memt_ref, pmb_ref, awct_ref, w_ref, out_ref):
    # q (B, D) ; memt = memory^T (B, E, T) ; pmb = processed_memory + bias (B, T, A)
    # awct = attention_weights_cat time-major (B, T, 2)
    # w_pack (2K + D + 1, A) = [W_loc (2K) ; Wq^T (D) ; avp*v (1)]

    # ---- in-kernel im2col: the 3 conv taps (zero-padded) per channel ---------
    awct = awct_ref[...]                                       # (B, T, 2)
    z = jnp.zeros((B, 1, 2), jnp.float32)
    prev = jnp.concatenate([z, awct[:, :T - 1, :]], axis=1)    # value at t-1 (k=0)
    nxt = jnp.concatenate([awct[:, 1:, :], z], axis=1)         # value at t+1 (k=2)

    # fused LHS [im2col | q per timestep]: column j<6 is tap k=j//2, channel j%2
    qb = jnp.broadcast_to(q_ref[...][:, None, :], (B, T, D_LSTM))
    x = jnp.concatenate([prev, awct, nxt, qb], axis=-1)        # (B, T, 2K+D)

    # ---- ONE MXU op: location term + processed query, already summed ---------
    wp = w_ref[...]                                            # (2K+D+1, A)
    y = jnp.dot(x.reshape(B * T, W_ROWS), wp[:W_ROWS, :],
                preferred_element_type=jnp.float32)            # (B*T, A)

    # energies = (avp*v) . tanh(loc + pq + processed_memory + bias)
    h = jnp.tanh(y.reshape(B, T, A_DIM) + pmb_ref[...])        # bias pre-folded
    align = jnp.sum(h * wp[W_ROWS:, :], axis=-1)               # (B, T)

    # softmax over time (lane axis); exact normalization — these weights feed the
    # cumulative-attention state of subsequent decoder steps.
    m = jnp.max(align, axis=-1, keepdims=True)
    p = jnp.exp(align - m)
    w = p / jnp.sum(p, axis=-1, keepdims=True)                 # (B, T)

    # attention context on the VPU/XLU (T=8 contraction: no MXU fill/drain)
    ctx = jnp.sum(w[:, None, :] * memt_ref[...], axis=-1)      # (B, E)

    # single lane-dense output slab: [context | attention_weights]
    out_ref[...] = jnp.concatenate([ctx, w], axis=-1)          # (B, E + T)


# ---- one-time parameter preparation (NOT in the per-step hot path) -----------
def prepare_params(params):
    """Fold PyTorch-shaped weights once and pack them into a single VMEM ref."""
    wq, wconv, wd, wv, avp, bias = params
    # conv weight (F, 2, K) -> (K, 2, F) -> (2K, F); row j = 2*k + c matches the
    # in-kernel column order [prev_c0, prev_c1, cur_c0, cur_c1, next_c0, next_c1].
    wconv_kc = jnp.transpose(wconv, (2, 1, 0)).reshape(LOC_COLS, N_FILT)
    w_loc = jnp.dot(wconv_kc, jnp.transpose(wd))               # (2K, A) conv+dense fold
    wq_t = jnp.transpose(wq)                                   # (D, A)
    v_eff = avp * wv                                           # (1, A)
    w_pack = jnp.concatenate([w_loc, wq_t, v_eff], axis=0)     # (2K+D+1, A)
    return w_pack, bias


def prepare_utterance(memory, processed_memory, bias):
    """Once per utterance (step-invariant): fold the attention bias into
    processed_memory and pre-transpose memory so the context reduction stays on
    the VPU with T in the lane dimension."""
    memory_t = jnp.transpose(memory, (0, 2, 1))                # (B, E, T)
    pm_b = processed_memory + bias                             # (B, T, A)
    return memory_t, pm_b


# ---- per-step wrapper (glue + pallas_call) -----------------------------------
@jax.jit
def attention_forward(query, memory_t, processed_memory_b, attention_weights_cat,
                      mask, w_pack):
    del mask  # unused by the reference forward pass
    # time-major layout for the weights-cat; in the real decoder this layout is
    # produced directly (it is just a cat of two (B,T) arrays along a new axis).
    awc_t = jnp.transpose(attention_weights_cat, (0, 2, 1))    # (B, T, 2)

    vmem = pl.BlockSpec(memory_space=pltpu.MemorySpace.VMEM)
    out = pl.pallas_call(
        attention_kernel,
        out_shape=jax.ShapeDtypeStruct((B, E_DIM + T), jnp.float32),
        in_specs=[vmem] * 5,
        out_specs=vmem,
    )(query, memory_t, processed_memory_b, awc_t, w_pack)
    return out[:, :E_DIM], out[:, E_DIM:]                      # ctx (B,E), attw (B,T)


# ---- pure-JAX reference (matches the PyTorch forward) ------------------------
def attention_ref(query, memory, processed_memory, attention_weights_cat, mask, params):
    del mask
    wq, wconv, wd, wv, avp, bias = params
    pq = query[:, None, :] @ wq.T                              # (B, 1, A)
    conv = jax.lax.conv_general_dilated(
        attention_weights_cat, wconv, window_strides=(1,),
        padding=[(PAD, PAD)], dimension_numbers=('NCH', 'OIH', 'NCH'))  # (B, F, T)
    loc = jnp.transpose(conv, (0, 2, 1)) @ wd.T                # (B, T, A)
    e = avp * jnp.tanh(pq + loc + processed_memory + bias)     # (B, T, A)
    align = (e @ wv.T)[..., 0]                                 # (B, T)
    w = jax.nn.softmax(align, axis=1)
    ctx = jnp.einsum('bt,bte->be', w, memory)
    return ctx, w


# ---- deterministic parameter init (shapes from Attention.__init__) -----------
def make_params(key):
    ks = jax.random.split(key, 6)

    def xavier(k, shape, fan_in, fan_out):
        s = sqrt(6.0 / (fan_in + fan_out))
        return jax.random.uniform(k, shape, jnp.float32, -s, s)

    wq = xavier(ks[0], (A_DIM, D_LSTM), D_LSTM, A_DIM)            # query_layer weight
    wconv = xavier(ks[1], (N_FILT, 2, KSIZE), 2 * KSIZE, N_FILT)  # location_conv weight
    wd = xavier(ks[2], (A_DIM, N_FILT), N_FILT, A_DIM)            # location_dense weight
    wv = xavier(ks[3], (1, A_DIM), A_DIM, 1)                      # v weight
    avp = xavier(ks[4], (1, A_DIM), A_DIM, 1)                     # attention_variable_projection
    bias = 0.1 * jax.random.normal(ks[5], (1, A_DIM), jnp.float32)  # nonzero: exercises the fold
    return (wq, wconv, wd, wv, avp, bias)


if __name__ == "__main__":
    key = jax.random.PRNGKey(0)
    kp, k1, k2, k3, k4 = jax.random.split(key, 5)

    params = make_params(kp)
    w_pack, bias = prepare_params(params)                      # one-time per model

    query = jax.random.normal(k1, (B, D_LSTM), jnp.float32)    # attention_hidden_state
    memory = jax.random.normal(k2, (B, T, E_DIM), jnp.float32)  # encoder outputs
    processed_memory = jax.random.normal(k3, (B, T, A_DIM), jnp.float32)
    attention_weights_cat = jax.nn.softmax(
        jax.random.normal(k4, (B, 2, T), jnp.float32), axis=-1)
    mask = jnp.zeros((B, T), jnp.bool_)                        # accepted but unused

    memory_t, pm_b = prepare_utterance(memory, processed_memory, bias)  # per utterance

    ctx, attw = attention_forward(query, memory_t, pm_b,
                                  attention_weights_cat, mask, w_pack)
    jax.block_until_ready((ctx, attw))

    ctx_ref, attw_ref_ = attention_ref(query, memory, processed_memory,
                                       attention_weights_cat, mask, params)
    assert ctx.shape == (B, E_DIM) and attw.shape == (B, T)
    # tolerance covers default-precision MXU matmul vs XLA conv/matmul reference
    assert jnp.allclose(ctx, ctx_ref, rtol=1e-2, atol=1e-2)
    assert jnp.allclose(attw, attw_ref_, rtol=1e-2, atol=1e-2)

    print("KERNEL_OK")
</pallas_src>

<mosaic_0001>
module attributes {stable_mosaic.version = 11 : i64} {
  func.func @attention_kernel(%arg0: memref<2x32xf32, #tpu.memory_space<vmem>>, %arg1: memref<2x24x8xf32, #tpu.memory_space<vmem>>, %arg2: memref<2x8x32xf32, #tpu.memory_space<vmem>>, %arg3: memref<2x8x2xf32, #tpu.memory_space<vmem>>, %arg4: memref<39x32xf32, #tpu.memory_space<vmem>>, %arg5: memref<2x32xf32, #tpu.memory_space<vmem>>) attributes {dimension_semantics = [], scalar_prefetch = 0 : i64, scratch_operands = 0 : i64, tpu.core_type = #tpu.core_type<tc>} {
    %c0 = arith.constant 0 : index
    %c0_0 = arith.constant 0 : index
    %c0_1 = arith.constant 0 : index
    %0 = vector.load %arg3[%c0, %c0_0, %c0_1] : memref<2x8x2xf32, #tpu.memory_space<vmem>>, vector<2x8x2xf32>
    %cst = arith.constant 0.000000e+00 : f32
    %1 = vector.broadcast %cst : f32 to vector<2x1x2xf32>
    %2 = vector.extract_strided_slice %0 {offsets = [0, 0, 0], sizes = [2, 7, 2], strides = [1, 1, 1]} : vector<2x8x2xf32> to vector<2x7x2xf32>
    %3 = tpu.concatenate %1, %2 in 1 : vector<2x1x2xf32>, vector<2x7x2xf32> -> vector<2x8x2xf32>
    %4 = vector.extract_strided_slice %0 {offsets = [0, 1, 0], sizes = [2, 7, 2], strides = [1, 1, 1]} : vector<2x8x2xf32> to vector<2x7x2xf32>
    %5 = tpu.concatenate %4, %1 in 1 : vector<2x7x2xf32>, vector<2x1x2xf32> -> vector<2x8x2xf32>
    %c0_2 = arith.constant 0 : index
    %c0_3 = arith.constant 0 : index
    %6 = vector.load %arg0[%c0_2, %c0_3] : memref<2x32xf32, #tpu.memory_space<vmem>>, vector<2x32xf32>
    %7 = vector.shape_cast %6 : vector<2x32xf32> to vector<2x1x32xf32>
    %8 = vector.shape_cast %7 : vector<2x1x32xf32> to vector<2x1x32xf32>
    %9 = vector.broadcast %8 : vector<2x1x32xf32> to vector<2x8x32xf32>
    %10 = tpu.concatenate %3, %0, %5, %9 in 2 : vector<2x8x2xf32>, vector<2x8x2xf32>, vector<2x8x2xf32>, vector<2x8x32xf32> -> vector<2x8x38xf32>
    %c0_4 = arith.constant 0 : index
    %c0_5 = arith.constant 0 : index
    %11 = vector.load %arg4[%c0_4, %c0_5] : memref<39x32xf32, #tpu.memory_space<vmem>>, vector<39x32xf32>
    %12 = vector.shape_cast %10 : vector<2x8x38xf32> to vector<16x38xf32>
    %13 = vector.extract_strided_slice %11 {offsets = [0, 0], sizes = [38, 32], strides = [1, 1]} : vector<39x32xf32> to vector<38x32xf32>
    %cst_6 = arith.constant dense<0.000000e+00> : vector<16x32xf32>
    %14 = tpu.matmul %12, %13, %cst_6 {dimension_numbers = #tpu.dot_dimension_numbers<[1], [0], [0], [1], [0, 0, 1, 1], [], []>} : vector<16x38xf32>, vector<38x32xf32>, vector<16x32xf32> -> vector<16x32xf32>
    %15 = vector.shape_cast %14 : vector<16x32xf32> to vector<2x8x32xf32>
    %c0_7 = arith.constant 0 : index
    %c0_8 = arith.constant 0 : index
    %c0_9 = arith.constant 0 : index
    %16 = vector.load %arg2[%c0_7, %c0_8, %c0_9] : memref<2x8x32xf32, #tpu.memory_space<vmem>>, vector<2x8x32xf32>
    %17 = arith.addf %15, %16 : vector<2x8x32xf32>
    %18 = math.tanh %17 : vector<2x8x32xf32>
    %19 = vector.extract_strided_slice %11 {offsets = [38, 0], sizes = [1, 32], strides = [1, 1]} : vector<39x32xf32> to vector<1x32xf32>
    %20 = vector.shape_cast %19 : vector<1x32xf32> to vector<1x1x32xf32>
    %21 = vector.broadcast %20 : vector<1x1x32xf32> to vector<2x8x32xf32>
    %22 = arith.mulf %18, %21 : vector<2x8x32xf32>
    %cst_10 = arith.constant dense<0.000000e+00> : vector<2x8xf32>
    %23 = vector.multi_reduction <add>, %22, %cst_10 [2] : vector<2x8x32xf32> to vector<2x8xf32>
    %cst_11 = arith.constant dense<0xFF800000> : vector<2xf32>
    %24 = vector.multi_reduction <maximumf>, %23, %cst_11 [1] : vector<2x8xf32> to vector<2xf32>
    %25 = vector.shape_cast %24 : vector<2xf32> to vector<2x1xf32>
    %26 = vector.broadcast %25 : vector<2x1xf32> to vector<2x8xf32>
    %27 = arith.subf %23, %26 : vector<2x8xf32>
    %28 = math.exp %27 : vector<2x8xf32>
    %cst_12 = arith.constant dense<0.000000e+00> : vector<2xf32>
    %29 = vector.multi_reduction <add>, %28, %cst_12 [1] : vector<2x8xf32> to vector<2xf32>
    %30 = vector.shape_cast %29 : vector<2xf32> to vector<2x1xf32>
    %31 = vector.broadcast %30 : vector<2x1xf32> to vector<2x8xf32>
    %32 = arith.divf %28, %31 : vector<2x8xf32>
    %33 = vector.shape_cast %32 : vector<2x8xf32> to vector<2x1x8xf32>
    %c0_13 = arith.constant 0 : index
    %c0_14 = arith.constant 0 : index
    %c0_15 = arith.constant 0 : index
    %34 = vector.load %arg1[%c0_13, %c0_14, %c0_15] : memref<2x24x8xf32, #tpu.memory_space<vmem>>, vector<2x24x8xf32>
    %35 = vector.broadcast %33 : vector<2x1x8xf32> to vector<2x24x8xf32>
    %36 = arith.mulf %35, %34 : vector<2x24x8xf32>
    %cst_16 = arith.constant dense<0.000000e+00> : vector<2x24xf32>
    %37 = vector.multi_reduction <add>, %36, %cst_16 [2] : vector<2x24x8xf32> to vector<2x24xf32>
    %38 = tpu.concatenate %37, %32 in 1 : vector<2x24xf32>, vector<2x8xf32> -> vector<2x32xf32>
    %c0_17 = arith.constant 0 : index
    %c0_18 = arith.constant 0 : index
    %39 = vector.load %arg5[%c0_17, %c0_18] : memref<2x32xf32, #tpu.memory_space<vmem>>, vector<2x32xf32>
    tpu.vector_store %arg5[%c0_17, %c0_18], %38 {strides = array<i32>} : memref<2x32xf32, #tpu.memory_space<vmem>>, vector<2x32xf32>,
    return
  }
}

</mosaic_0001>

<bundles_post_ra>
// kernel: attention_forward.1
= control target key start
LH: loop header
LB: loop body
LE: loop exit
PB: predicated region body
PF: predicated region fallthrough
CT: control target
= control target key end

     0   :  { %vm35_vm0 = vcmask 1046528   ;;  %v51_v0 = vlaneseq  ;;  %v1300_v4 = vmov 1966171168   ;;  %s1301_s24 = smov 2   ;;  %s1302_s6 = smov 4   ;;  %vm111_vm1 = vcmask 1045504   ;;  %s1788_s3 = inlined_call_operand.vmem [shape: f32[2,8,2], index: 3, kind: input, shape index: {}]   ;;  %s1789_s0 = inlined_call_operand.vmem [shape: f32[2,32], index: 0, kind: input, shape index: {}]   ;;  %s1790_s4 = inlined_call_operand.vmem [shape: f32[39,32], index: 4, kind: input, shape index: {}]   ;;  %s1791_s2 = inlined_call_operand.vmem [shape: f32[2,8,32], index: 2, kind: input, shape index: {}]   ;;  %s1792_s1 = inlined_call_operand.vmem [shape: f32[2,24,8], index: 1, kind: input, shape index: {}]   ;;  %s1793_s5 = inlined_call_operand.vmem [shape: f32[2,32], index: 5, kind: output, shape index: {}]  }
   0x1   :  { %v20_v1 = vld [vmem:[%s1788_s3] sm:$0xff]  ;;  %v21_v2 = vld [vmem:[%s1788_s3 + $0x8] sm:$0xff]  ;;  %v49_v5 = vunpack.c.l.s4 %v1300_v4  ;;  %v101_v13 = vld [vmem:[%s1790_s4 + $0x10] sm:$0xff]  ;;  %s1303_s9 = smov 6   ;;  %vm28_vm2 = vcmask 1040384   ;;  %vm90_vm3 = vcmask 15360  }
   0x2   :  { %v1249_v3 = vld.sshfl [vmem:[%s1789_s0] sm:$0x11 pattern:$0x75316420]  ;;  %70 = vrot.lane.b32.xlu0 %v20_v1, %s1301_s24  ;;  %v31_v6 = vrot.slane %v20_v1, 1  ;;  %v32_v7 = vrot.slane %v21_v2, 1 }
   0x3   :  { %v99_v8 = vld [vmem:[%s1790_s4] sm:$0xff]  ;;  %v50_v9 = vunpack.c.0.s8 %v49_v5  ;;  %v1348_v10 = vshrl.u32 %v51_v0, 7  ;;  %v47_v11 = vcombine.high %v1249_v3, %v1249_v3  ;;  %v100_v12 = vld [vmem:[%s1790_s4 + $0x8] sm:$0xff]  ;;  %v102_v14 = vld [vmem:[%s1790_s4 + $0x18] sm:$0xff]  ;;  %v24_v26 = vrot.slane %v20_v1, 7 }
   0x4   :  { %v36_v15 = vsel %vm35_vm0, %v31_v6, 0.0  ;;  %v1273_v18 = vpack.c.bf16 %v100_v12, %v99_v8  ;;  %v37_v19 = vsel %vm35_vm0, %v32_v7, 0.0  ;;  %v1277_v20 = vpack.c.bf16 %v102_v14, %v101_v13  ;;  %v103_v25 = vld [vmem:[%s1790_s4 + $0x20] sm:$0x7f]  ;;  %v191_v42 = vld [vmem:[%s1791_s2 + $0x8] sm:$0xff]  ;;  %v1425_v8 = vld [vmem:[%s1792_s1 + $0x18] sm:$0xff] }
   0x5   :  { %78 = vrot.lane.b32.xlu1 %v36_v15, %s1302_s6  ;;  %v53_v16 = vsub.s32 %v50_v9, %v1348_v10  ;;  %v1362_v17 = vsub.s32 0, %v1348_v10  ;;  %v25_v28 = vrot.slane %v21_v2, 7  ;;  %v29_v29 = vsel %vm28_vm2, 0.0, %v24_v26  ;;  %v190_v43 = vld [vmem:[%s1791_s2] sm:$0xff]  ;;  %v1391_v58 = vld [vmem:[%s1792_s1 + $0x8] sm:$0xff] }
   0x6   :  { %72 = vrot.lane.b32.xlu0 %v21_v2, %s1301_s24  ;;  %1274 = vmatprep.subr.bf16.mxu0 %v1273_v18  ;;  %vm93_vm4 = vcmask 31744   ;;  %vm96_vm5 = vcmask 48128   ;;  %vm104_vm6 = vcmask 310272   ;;  %v1377_v48 = vsub.s32 6, %v1348_v10  ;;  %v1386_v57 = vld [vmem:[%s1792_s1] sm:$0xff] }
   0x7   :  { %v54_v21 = vrot.slane %v1249_v3, %v53_v16  ;;  %v61_v22 = vrot.slane %v47_v11, %v53_v16  ;;  %1276 = vmatpush3.bf16.msra.mxu0 %v1273_v18  ;;  %v30_v32 = vsel %vm28_vm2, 0.0, %v25_v28  ;;  %vm202_vm7 = vcmask 261120   ;;  %v1412_v3 = vld [vmem:[%s1792_s1 + $0x10] sm:$0xff] }
   0x8   :  { %1278 = vmatprep.subr.bf16.mxu0 %v1277_v20  ;;  %v199_v49 = vrot.slane %v103_v25, %v1377_v48  ;;  %v1381_v56 = vsub.s32 3, %v1348_v10  ;;  %v352_v60 = vrot.slane %v1391_v58, %v1362_v17  ;;  %v1398_v61 = vsub.s32 2, %v1348_v10 }
   0x9   :  { %80 = vrot.lane.b32.xlu1 %v37_v19, %s1302_s6  ;;  %v65_v23 = vrot.slane %v54_v21, %v1362_v17  ;;  %v69_v24 = vrot.slane %v61_v22, %v1362_v17  ;;  %v1403_v63 = vsub.s32 4, %v1348_v10  ;;  %v394_v2 = vrot.slane %v1391_v58, %v1377_v48  ;;  %v1449_v22 = vld [vmem:[%s1792_s1 + $0x20] sm:$0xff] }
   0xa   :  { %v317_v59 = vrot.slane %v1386_v57, %v1381_v56  ;;  %v366_v62 = vrot.slane %v1391_v58, %v1398_v61  ;;  %v408_v4 = vrot.slane %v1412_v3, %v1362_v17  ;;  %v422_v5 = vrot.slane %v1412_v3, %v1398_v61 }
   0xb   :  { %84 = vrot.lane.b32.xlu0 %v65_v23, %s1303_s9  ;;  %1280 = vmatpush3.bf16.msra.mxu0 %v1277_v20  ;;  %v380_v1 = vrot.slane %v1391_v58, %v1403_v63  ;;  %v436_v6 = vrot.slane %v1412_v3, %v1403_v63  ;;  %v450_v7 = vrot.slane %v1412_v3, %v1377_v48  ;;  %v1434_v13 = vand.u32 127, %v51_v0 }
   0xc   :  { %1268 = vmatprep.subr.msk.mxu0 %vm111_vm1, %v103_v25  ;;  %v464_v9 = vrot.slane %v1425_v8, %v1362_v17  ;;  %v478_v11 = vrot.slane %v1425_v8, %v1398_v61  ;;  %v492_v12 = vrot.slane %v1425_v8, %v1403_v63  ;;  %vm221_vm8 = vcmask 1041409  }
   0xd   :  { %86 = vrot.lane.b32.xlu1 %v69_v24, %s1303_s9  ;;  %v1438_v14 = vsub.s32 %v1434_v13, %v1348_v10  ;;  %vm224_vm9 = vcmask 58368   ;;  %v506_v0 = vrot.slane %v1425_v8, %v1377_v48  ;;  %v296_v23 = vrot.slane %v1386_v57, %v1362_v17 }
   0xe   :  { %v1454_v24 = vsub.s32 1, %v1348_v10  ;;  %v534_v26 = vrot.slane %v1449_v22, %v1398_v61  ;;  %v1304_v28 = vmov 0   ;;  %vm1110_vm10 = vcmask 1042434  }
   0xf   :  { %1269 = vmatpush3.msk.msra.mxu0 %vm111_vm1, %v103_v25  ;;  %v520_v25 = vrot.slane %v1449_v22, %v1362_v17  ;;  %1287 = vset.pattern.permute.xlu1 %v1304_v28  ;;  %vm1112_vm11 = vcmask 1043459   ;;  %vm1114_vm12 = vcmask 1044484   ;;  %vm1116_vm13 = vcmask 1045509  }
  0x10   :  { %1286 = vset.pattern.permute.xlu0 %v1304_v28  ;;  %vm1118_vm14 = vcmask 1046534   ;;  %vm1120_vm15 = vcmask 1047559   ;;  %vm1163_vm0 = vcmask 64512   ;;  %vm1197_vm1 = vcmask 130112  }
  0x11   :  { %vm1204_vm2 = vcmask 195712  }
  0x74   :  { %v71_v27 = vpop.permute.xlu0 %70 }
  0x75   :  { %v91_v33 = vsel %vm90_vm3, %v29_v29, %v71_v27  ;;  %v303_v27 = vrot.slane %v1386_v57, %v1454_v24  ;;  %v548_v29 = vrot.slane %v1449_v22, %v1403_v63 }
  0x77   :  { %v79_v30 = vpop.permute.xlu1 %78 }
  0x78   :  { %v73_v31 = vpop.permute.xlu0 %72  ;;  %v94_v36 = vsel %vm93_vm4, %v91_v33, %v79_v30  ;;  %v310_v30 = vrot.slane %v1386_v57, %v1398_v61 }
  0x79   :  { %v92_v35 = vsel %vm90_vm3, %v30_v32, %v73_v31  ;;  %v324_v31 = vrot.slane %v1386_v57, %v1403_v63  ;;  %v1469_v32 = vsub.s32 5, %v1348_v10  ;;  %vm1241_vm3 = vcmask 195584  }
  0x7b   :  { %v81_v34 = vpop.permute.xlu1 %80  ;;  %v331_v33 = vrot.slane %v1386_v57, %v1469_v32 }
  0x7c   :  { %v95_v39 = vsel %vm93_vm4, %v92_v35, %v81_v34  ;;  %v338_v34 = vrot.slane %v1386_v57, %v1377_v48  ;;  %v1476_v35 = vsub.s32 7, %v1348_v10  ;;  %vm1243_vm4 = vcmask 254976  }
  0x7d   :  { %v85_v37 = vpop.permute.xlu0 %84 }
  0x7e   :  { %v97_v38 = vsel %vm96_vm5, %v94_v36, %v85_v37  ;;  %v345_v36 = vrot.slane %v1386_v57, %v1476_v35  ;;  %v359_v37 = vrot.slane %v1391_v58, %v1454_v24  ;;  %v429_v57 = vrot.slane %v1412_v3, %v1381_v56 }
  0x7f   :  { %1270 = vmatprep.mubr.msk.f32.mxu0 %vm104_vm6, %v97_v38  ;;  %v87_v40 = vpop.permute.xlu1 %86  ;;  %v373_v38 = vrot.slane %v1391_v58, %v1381_v56 }
  0x80   :  { %v98_v41 = vsel %vm96_vm5, %v95_v39, %v87_v40 }
  0x81   :  { %1271 = vmatmul.mubr.msk.f32.vlgmr.msra.gmra.mrb[0].mxu0 %vm104_vm6, %v98_v41 }
 0x154   :  { %v1272_v44 = vpop.f32.mrb[0].mxu0 }
 0x155   :  { %v193_v45 = vadd.f32 %v1272_v44, %v191_v42  ;;  %v181_v46 = vpop.f32.mrb[1].mxu0 }
 0x156   :  { %v192_v47 = vadd.f32 %v190_v43, %v181_v46 }
 0x157   :  { %1288 = vtanh.f32 %v193_v45 }
 0x158   :  { %1290 = vtanh.f32 %v192_v47 }
 0x161   :  { %v1289_v50 = vpop.eup %1288 }
 0x162   :  { %v1291_v51 = vpop.eup %1290  ;;  %v201_v52 = vmul.f32 %v1289_v50, %v199_v49  ;;  %v562_v50 = vrot.slane %v1449_v22, %v1377_v48 }
 0x163   :  { %v200_v53 = vmul.f32 %v1291_v51, %v199_v49  ;;  %v387_v49 = vrot.slane %v1391_v58, %v1469_v32  ;;  %v286_v51 = vld [vmem:[%s1792_s1 + $0x28] sm:$0xff] }
 0x164   :  { %v206_v54 = vsel %vm202_vm7, %v201_v52, 0.0  ;;  %v401_v52 = vrot.slane %v1391_v58, %v1476_v35  ;;  %v443_v58 = vrot.slane %v1412_v3, %v1469_v32 }
 0x165   :  { %207 = vadd.xlane.f32.xlu1 %v206_v54  ;;  %v203_v55 = vsel %vm202_vm7, %v200_v53, 0.0  ;;  %v576_v53 = vrot.slane %v286_v51, %v1362_v17  ;;  %v415_v54 = vrot.slane %v1412_v3, %v1454_v24 }
 0x166   :  { %204 = vadd.xlane.f32.xlu0 %v203_v55  ;;  %v590_v55 = vrot.slane %v286_v51, %v1398_v61  ;;  %v471_v61 = vrot.slane %v1425_v8, %v1454_v24 }
 0x176   :  { %319 = vbcast.lane.b32.xlu1 %v317_v59, 256  ;;  %v604_v59 = vrot.slane %v286_v51, %v1403_v63  ;;  %v485_v63 = vrot.slane %v1425_v8, %v1381_v56 }
 0x17a   :  { %354 = vbcast.lane.b32.xlu1 %v352_v60, 256  ;;  %v618_v60 = vrot.slane %v286_v51, %v1377_v48  ;;  %v513_v48 = vrot.slane %v1425_v8, %v1476_v35 }
 0x17e   :  { %368 = vbcast.lane.b32.xlu1 %v366_v62, 256  ;;  %v457_v62 = vrot.slane %v1412_v3, %v1476_v35 }
 0x182   :  { %382 = vbcast.lane.b32.xlu1 %v380_v1, 256  ;;  %v499_v1 = vrot.slane %v1425_v8, %v1469_v32  ;;  %v569_v8 = vrot.slane %v1449_v22, %v1476_v35 }
 0x186   :  { %396 = vbcast.lane.b32.xlu1 %v394_v2, 256 }
 0x18a   :  { %410 = vbcast.lane.b32.xlu1 %v408_v4, 256  ;;  %v527_v4 = vrot.slane %v1449_v22, %v1454_v24 }
 0x18e   :  { %424 = vbcast.lane.b32.xlu1 %v422_v5, 256  ;;  %v541_v5 = vrot.slane %v1449_v22, %v1381_v56 }
 0x192   :  { %438 = vbcast.lane.b32.xlu1 %v436_v6, 256 }
 0x196   :  { %452 = vbcast.lane.b32.xlu1 %v450_v7, 256  ;;  %v555_v7 = vrot.slane %v1449_v22, %v1469_v32 }
 0x19a   :  { %466 = vbcast.lane.b32.xlu1 %v464_v9, 256 }
 0x19e   :  { %480 = vbcast.lane.b32.xlu1 %v478_v11, 256  ;;  %v583_v11 = vrot.slane %v286_v51, %v1454_v24 }
 0x1a2   :  { %494 = vbcast.lane.b32.xlu1 %v492_v12, 256 }
 0x1a6   :  { %508 = vbcast.lane.b32.xlu1 %v506_v0, 256 }
 0x1aa   :  { %522 = vbcast.lane.b32.xlu1 %v520_v25, 256 }
 0x1ae   :  { %536 = vbcast.lane.b32.xlu1 %v534_v26, 256 }
 0x1b2   :  { %550 = vbcast.lane.b32.xlu1 %v548_v29, 256 }
 0x1f2   :  { %v208_v15 = vpop.xlane.xlu1 %207 }
 0x1f3   :  { %v220_v16 = vrot.slane %v208_v15, %v1438_v14  ;;  %v205_v18 = vpop.xlane.xlu0 %204 }
 0x1f4   :  { %v216_v19 = vrot.slane %v205_v18, %v1438_v14 }
 0x1f6   :  { %v222_v20 = vsel %vm221_vm8, %v220_v16, %v216_v19  ;;  %v1519_v2 = vpop.permute.xlu1 %319  ;;  %v625_v19 = vrot.slane %v286_v51, %v1476_v35 }
 0x1f7   :  { %v225_v21 = vsel %vm224_vm9, %v222_v20, -inf }
 0x1f8   :  { %226 = vmax.xlane.f32.xlu0 %v225_v21 }
 0x1fa   :  { %v1523_v3 = vpop.permute.xlu1 %354 }
 0x1fe   :  { %v1529_v6 = vpop.permute.xlu1 %368 }
 0x202   :  { %v1533_v9 = vpop.permute.xlu1 %382 }
 0x206   :  { %v1538_v12 = vpop.permute.xlu1 %396 }
 0x20a   :  { %v1541_v16 = vpop.permute.xlu1 %410 }
 0x20e   :  { %298 = vbcast.lane.b32.xlu0 %v296_v23, 256  ;;  %v1545_v20 = vpop.permute.xlu1 %424 }
 0x212   :  { %305 = vbcast.lane.b32.xlu0 %v303_v27, 256  ;;  %v1547_v0 = vpop.permute.xlu1 %438 }
 0x216   :  { %312 = vbcast.lane.b32.xlu0 %v310_v30, 256  ;;  %v1549_v23 = vpop.permute.xlu1 %452 }
 0x21a   :  { %326 = vbcast.lane.b32.xlu0 %v324_v31, 256  ;;  %v1551_v26 = vpop.permute.xlu1 %466 }
 0x21e   :  { %333 = vbcast.lane.b32.xlu0 %v331_v33, 256  ;;  %v1553_v27 = vpop.permute.xlu1 %480 }
 0x222   :  { %340 = vbcast.lane.b32.xlu0 %v338_v34, 256  ;;  %v1555_v29 = vpop.permute.xlu1 %494 }
 0x226   :  { %347 = vbcast.lane.b32.xlu0 %v345_v36, 256  ;;  %v1557_v31 = vpop.permute.xlu1 %508 }
 0x22a   :  { %361 = vbcast.lane.b32.xlu0 %v359_v37, 256  ;;  %v1559_v33 = vpop.permute.xlu1 %522 }
 0x22e   :  { %375 = vbcast.lane.b32.xlu0 %v373_v38, 256  ;;  %v1561_v35 = vpop.permute.xlu1 %536 }
 0x232   :  { %v1563_v37 = vpop.permute.xlu1 %550 }
 0x285   :  { %v227_v39 = vpop.xlane.xlu0 %226 }
 0x286   :  { %v232_v40 = vrot.slane %v227_v39, %v1362_v17  ;;  %v236_v41 = vrot.slane %v227_v39, %v1454_v24 }
 0x288   :  { %v239_v42 = vsub.f32 %v205_v18, %v232_v40  ;;  %v240_v43 = vsub.f32 %v208_v15, %v236_v41  ;;  %v597_v15 = vrot.slane %v286_v51, %v1381_v56  ;;  %v611_v18 = vrot.slane %v286_v51, %v1469_v32 }
 0x289   :  { %v299_v21 = vpop.permute.xlu0 %298 }
 0x28a   :  { %v241_v44 = vmul.f32 1.442695, %v239_v42  ;;  %v243_v45 = vmul.f32 1.442695, %v240_v43 }
 0x28c   :  { %1292 = vpow2.f32 %v241_v44 }
 0x28d   :  { %1294 = vpow2.f32 %v243_v45  ;;  %v306_v22 = vpop.permute.xlu0 %305 }
 0x291   :  { %v313_v25 = vpop.permute.xlu0 %312 }
 0x295   :  { %v327_v56 = vpop.permute.xlu0 %326 }
 0x296   :  { %v1486_v46 = vpop.eup %1292 }
 0x297   :  { %v1488_v47 = vpop.eup %1294  ;;  %248 = vperm.xlu0 %1286, %v1486_v46  }
 0x298   :  { %251 = vperm.xlu1 %1287, %v1488_v47  }
 0x299   :  { %v334_v28 = vpop.permute.xlu0 %333 }
 0x29b   :  { %389 = vbcast.lane.b32.xlu0 %v387_v49, 256 }
 0x29c   :  { %564 = vbcast.lane.b32.xlu1 %v562_v50, 256 }
 0x29d   :  { %v341_v30 = vpop.permute.xlu0 %340 }
 0x29f   :  { %403 = vbcast.lane.b32.xlu0 %v401_v52, 256 }
 0x2a0   :  { %578 = vbcast.lane.b32.xlu1 %v576_v53, 256 }
 0x2a1   :  { %v348_v32 = vpop.permute.xlu0 %347 }
 0x2a3   :  { %417 = vbcast.lane.b32.xlu0 %v415_v54, 256 }
 0x2a4   :  { %592 = vbcast.lane.b32.xlu1 %v590_v55, 256 }
 0x2a5   :  { %v362_v34 = vpop.permute.xlu0 %361 }
 0x2a7   :  { %431 = vbcast.lane.b32.xlu0 %v429_v57, 256 }
 0x2a8   :  { %606 = vbcast.lane.b32.xlu1 %v604_v59, 256 }
 0x2a9   :  { %v376_v36 = vpop.permute.xlu0 %375 }
 0x2ab   :  { %445 = vbcast.lane.b32.xlu0 %v443_v58, 256 }
 0x2ac   :  { %620 = vbcast.lane.b32.xlu1 %v618_v60, 256 }
 0x2af   :  { %459 = vbcast.lane.b32.xlu0 %v457_v62, 256 }
 0x2b3   :  { %473 = vbcast.lane.b32.xlu0 %v471_v61, 256 }
 0x2b7   :  { %487 = vbcast.lane.b32.xlu0 %v485_v63, 256 }
 0x2bb   :  { %501 = vbcast.lane.b32.xlu0 %v499_v1, 256 }
 0x2bf   :  { %515 = vbcast.lane.b32.xlu0 %v513_v48, 256 }
 0x2c3   :  { %529 = vbcast.lane.b32.xlu0 %v527_v4, 256 }
 0x2c7   :  { %543 = vbcast.lane.b32.xlu0 %v541_v5, 256 }
 0x2cb   :  { %557 = vbcast.lane.b32.xlu0 %v555_v7, 256 }
 0x2cf   :  { %571 = vbcast.lane.b32.xlu0 %v569_v8, 256 }
 0x2d3   :  { %585 = vbcast.lane.b32.xlu0 %v583_v11, 256 }
 0x2d7   :  { %599 = vbcast.lane.b32.xlu0 %v597_v15, 256 }
 0x2db   :  { %613 = vbcast.lane.b32.xlu0 %v611_v18, 256 }
 0x2df   :  { %627 = vbcast.lane.b32.xlu0 %v625_v19, 256 }
 0x316   :  { %v249_v38 = vpop.permute.xlu0 %248 }
 0x317   :  { %v252_v39 = vpop.permute.xlu1 %251  ;;  %v256_v40 = vrot.slane %v249_v38, %v1438_v14 }
 0x318   :  { %v260_v41 = vrot.slane %v252_v39, %v1438_v14 }
 0x31a   :  { %v261_v42 = vsel %vm221_vm8, %v260_v41, %v256_v40  ;;  %v390_v51 = vpop.permute.xlu0 %389 }
 0x31b   :  { %v263_v43 = vsel %vm224_vm9, %v261_v42, 0.0  ;;  %v1569_v44 = vpop.permute.xlu1 %564 }
 0x31c   :  { %264 = vadd.xlane.f32.xlu1 %v263_v43 }
 0x31e   :  { %v404_v53 = vpop.permute.xlu0 %403 }
 0x31f   :  { %v1571_v45 = vpop.permute.xlu1 %578 }
 0x322   :  { %v418_v57 = vpop.permute.xlu0 %417 }
 0x323   :  { %v1573_v49 = vpop.permute.xlu1 %592 }
 0x326   :  { %v432_v59 = vpop.permute.xlu0 %431 }
 0x327   :  { %v1575_v50 = vpop.permute.xlu1 %606 }
 0x32a   :  { %v446_v62 = vpop.permute.xlu0 %445 }
 0x32b   :  { %v1577_v52 = vpop.permute.xlu1 %620 }
 0x3a9   :  { %v265_v54 = vpop.xlane.xlu1 %264 }
 0x3aa   :  { %v270_v55 = vrot.slane %v265_v54, %v1362_v17  ;;  %v1588_v17 = vpop.permute.xlu0 %459 }
 0x3ac   :  { %1296 = vrcp.f32 %v270_v55 }
 0x3ae   :  { %v474_v5 = vpop.permute.xlu0 %473 }
 0x3b2   :  { %v488_v15 = vpop.permute.xlu0 %487 }
 0x3b6   :  { %v1297_v58 = vpop.eup %1296 }
 0x3b7   :  { %v1581_v60 = vmul.f32 %v1297_v58, %v1486_v46 }
 0x3b9   :  { %v678_v61 = vmul.f32 %v306_v22, %v1581_v60  ;;  %v677_v63 = vmul.f32 %v299_v21, %v1581_v60  ;;  %v680_v1 = vmul.f32 %v1519_v2, %v1581_v60  ;;  %v679_v48 = vmul.f32 %v313_v25, %v1581_v60  ;;  %v502_v21 = vpop.permute.xlu0 %501 }
 0x3ba   :  { %v682_v4 = vmul.f32 %v334_v28, %v1581_v60  ;;  %v681_v46 = vmul.f32 %v327_v56, %v1581_v60  ;;  %v684_v7 = vmul.f32 %v348_v32, %v1581_v60  ;;  %v683_v8 = vmul.f32 %v341_v30, %v1581_v60 }
 0x3bb   :  { %777 = vperm.xlu0 %1286, %v678_v61   ;;  %774 = vperm.xlu1 %1287, %v677_v63   ;;  %v686_v2 = vmul.f32 %v362_v34, %v1581_v60  ;;  %v685_v11 = vmul.f32 %v1523_v3, %v1581_v60  ;;  %v688_v18 = vmul.f32 %v376_v36, %v1581_v60 }
 0x3bc   :  { %v687_v19 = vmul.f32 %v1529_v6, %v1581_v60  ;;  %v274_v22 = vrot.slane %v265_v54, %v1454_v24  ;;  %v689_v25 = vmul.f32 %v1533_v9, %v1581_v60  ;;  %v690_v56 = vmul.f32 %v390_v51, %v1581_v60 }
 0x3bd   :  { %v691_v3 = vmul.f32 %v1538_v12, %v1581_v60  ;;  %v692_v28 = vmul.f32 %v404_v53, %v1581_v60  ;;  %v1607_v30 = vpop.permute.xlu0 %515  ;;  %v693_v24 = vmul.f32 %v1541_v16, %v1581_v60  ;;  %v694_v6 = vmul.f32 %v418_v57, %v1581_v60 }
 0x3be   :  { %1298 = vrcp.f32 %v274_v22  ;;  %v695_v32 = vmul.f32 %v1545_v20, %v1581_v60  ;;  %v696_v34 = vmul.f32 %v432_v59, %v1581_v60  ;;  %v697_v38 = vmul.f32 %v1547_v0, %v1581_v60 }
 0x3bf   :  { %783 = vperm.xlu0 %1286, %v680_v1   ;;  %780 = vperm.xlu1 %1287, %v679_v48   ;;  %v698_v16 = vmul.f32 %v446_v62, %v1581_v60  ;;  %v699_v40 = vmul.f32 %v1549_v23, %v1581_v60 }
 0x3c1   :  { %v530_v9 = vpop.permute.xlu0 %529 }
 0x3c3   :  { %789 = vperm.xlu0 %1286, %v682_v4   ;;  %786 = vperm.xlu1 %1287, %v681_v46  }
 0x3c5   :  { %v544_v39 = vpop.permute.xlu0 %543 }
 0x3c7   :  { %795 = vperm.xlu0 %1286, %v684_v7   ;;  %792 = vperm.xlu1 %1287, %v683_v8  }
 0x3c8   :  { %v1299_v12 = vpop.eup %1298 }
 0x3c9   :  { %v1616_v36 = vmul.f32 %v1299_v12, %v1488_v47  ;;  %v558_v41 = vpop.permute.xlu0 %557 }
 0x3cb   :  { %801 = vperm.xlu0 %1286, %v686_v2   ;;  %798 = vperm.xlu1 %1287, %v685_v11   ;;  %v701_v20 = vmul.f32 %v1551_v26, %v1616_v36  ;;  %v709_v47 = vmul.f32 %v1559_v33, %v1616_v36  ;;  %v702_v42 = vmul.f32 %v474_v5, %v1616_v36 }
 0x3cc   :  { %v703_v0 = vmul.f32 %v1553_v27, %v1616_v36  ;;  %v710_v43 = vmul.f32 %v530_v9, %v1616_v36  ;;  %v717_v23 = vmul.f32 %v1571_v45, %v1616_v36  ;;  %v711_v26 = vmul.f32 %v1561_v35, %v1616_v36 }
 0x3cd   :  { %v572_v51 = vpop.permute.xlu0 %571  ;;  %v704_v54 = vmul.f32 %v488_v15, %v1616_v36  ;;  %v719_v27 = vmul.f32 %v1573_v49, %v1616_v36  ;;  %v712_v55 = vmul.f32 %v544_v39, %v1616_v36  ;;  %v713_v45 = vmul.f32 %v1563_v37, %v1616_v36 }
 0x3ce   :  { %v705_v35 = vmul.f32 %v1555_v29, %v1616_v36  ;;  %v706_v58 = vmul.f32 %v502_v21, %v1616_v36  ;;  %v721_v49 = vmul.f32 %v1575_v50, %v1616_v36  ;;  %v714_v62 = vmul.f32 %v558_v41, %v1616_v36 }
 0x3cf   :  { %807 = vperm.xlu0 %1286, %v688_v18   ;;  %804 = vperm.xlu1 %1287, %v687_v19   ;;  %v715_v37 = vmul.f32 %v1569_v44, %v1616_v36  ;;  %v707_v29 = vmul.f32 %v1557_v31, %v1616_v36  ;;  %v708_v1 = vmul.f32 %v1607_v30, %v1616_v36 }
 0x3d0   :  { %v723_v50 = vmul.f32 %v1577_v52, %v1616_v36  ;;  %v716_v48 = vmul.f32 %v572_v51, %v1616_v36  ;;  %v700_v44 = vmul.f32 %v1588_v17, %v1581_v60 }
 0x3d1   :  { %v586_v33 = vpop.permute.xlu0 %585 }
 0x3d2   :  { %v718_v53 = vmul.f32 %v586_v33, %v1616_v36 }
 0x3d3   :  { %810 = vperm.xlu1 %1287, %v689_v25   ;;  %813 = vperm.xlu0 %1286, %v690_v56  }
 0x3d5   :  { %v600_v57 = vpop.permute.xlu0 %599 }
 0x3d6   :  { %v720_v59 = vmul.f32 %v600_v57, %v1616_v36 }
 0x3d7   :  { %816 = vperm.xlu1 %1287, %v691_v3   ;;  %819 = vperm.xlu0 %1286, %v692_v28  }
 0x3d9   :  { %v614_v61 = vpop.permute.xlu0 %613 }
 0x3da   :  { %v722_v63 = vmul.f32 %v614_v61, %v1616_v36 }
 0x3db   :  { %822 = vperm.xlu1 %1287, %v693_v24   ;;  %825 = vperm.xlu0 %1286, %v694_v6  }
 0x3dd   :  { %v628_v4 = vpop.permute.xlu0 %627 }
 0x3de   :  { %v724_v31 = vmul.f32 %v628_v4, %v1616_v36 }
 0x3df   :  { %828 = vperm.xlu1 %1287, %v695_v32   ;;  %831 = vperm.xlu0 %1286, %v696_v34  }
 0x3e3   :  { %834 = vperm.xlu1 %1287, %v697_v38   ;;  %837 = vperm.xlu0 %1286, %v698_v16  }
 0x3e7   :  { %840 = vperm.xlu1 %1287, %v699_v40   ;;  %846 = vperm.xlu0 %1286, %v701_v20  }
 0x3eb   :  { %870 = vperm.xlu0 %1286, %v709_v47   ;;  %849 = vperm.xlu1 %1287, %v702_v42  }
 0x3ef   :  { %852 = vperm.xlu0 %1286, %v703_v0   ;;  %873 = vperm.xlu1 %1287, %v710_v43  }
 0x3f3   :  { %894 = vperm.xlu0 %1286, %v717_v23   ;;  %876 = vperm.xlu1 %1287, %v711_v26  }
 0x3f7   :  { %855 = vperm.xlu0 %1286, %v704_v54   ;;  %897 = vperm.xlu1 %1287, %v718_v53  }
 0x3fb   :  { %900 = vperm.xlu0 %1286, %v719_v27   ;;  %879 = vperm.xlu1 %1287, %v712_v55  }
 0x3ff   :  { %882 = vperm.xlu0 %1286, %v713_v45   ;;  %858 = vperm.xlu1 %1287, %v705_v35  }
 0x403   :  { %861 = vperm.xlu0 %1286, %v706_v58   ;;  %903 = vperm.xlu1 %1287, %v720_v59  }
 0x407   :  { %906 = vperm.xlu0 %1286, %v721_v49   ;;  %885 = vperm.xlu1 %1287, %v714_v62  }
 0x40b   :  { %888 = vperm.xlu0 %1286, %v715_v37   ;;  %864 = vperm.xlu1 %1287, %v707_v29  }
 0x40f   :  { %867 = vperm.xlu0 %1286, %v708_v1   ;;  %909 = vperm.xlu1 %1287, %v722_v63  }
 0x413   :  { %912 = vperm.xlu0 %1286, %v723_v50   ;;  %891 = vperm.xlu1 %1287, %v716_v48  }
 0x417   :  { %843 = vperm.xlu1 %1287, %v700_v44   ;;  %915 = vperm.xlu0 %1286, %v724_v31  }
 0x43a   :  { %v775_v46 = vpop.permute.xlu1 %774  ;;  %v778_v5 = vpop.permute.xlu0 %777 }
 0x43b   :  { %v920_v7 = vrot.slane %v775_v46, %v1438_v14  ;;  %v924_v8 = vrot.slane %v778_v5, %v1438_v14 }
 0x43d   :  { %v1109_v15 = vsel %vm221_vm8, %v924_v8, %v920_v7 }
 0x43e   :  { %v781_v52 = vpop.permute.xlu1 %780  ;;  %v784_v2 = vpop.permute.xlu0 %783 }
 0x43f   :  { %v928_v11 = vrot.slane %v781_v52, %v1438_v14  ;;  %v932_v18 = vrot.slane %v784_v2, %v1438_v14 }
 0x441   :  { %v1111_v19 = vsel %vm1110_vm10, %v928_v11, %v1109_v15 }
 0x442   :  { %v787_v17 = vpop.permute.xlu1 %786  ;;  %v790_v21 = vpop.permute.xlu0 %789  ;;  %v1113_v25 = vsel %vm1112_vm11, %v932_v18, %v1111_v19 }
 0x443   :  { %v936_v22 = vrot.slane %v787_v17, %v1438_v14  ;;  %v940_v56 = vrot.slane %v790_v21, %v1438_v14 }
 0x445   :  { %v1115_v3 = vsel %vm1114_vm12, %v936_v22, %v1113_v25 }
 0x446   :  { %v793_v28 = vpop.permute.xlu1 %792  ;;  %v796_v30 = vpop.permute.xlu0 %795  ;;  %v1117_v9 = vsel %vm1116_vm13, %v940_v56, %v1115_v3 }
 0x447   :  { %v944_v24 = vrot.slane %v793_v28, %v1438_v14  ;;  %v948_v6 = vrot.slane %v796_v30, %v1438_v14 }
 0x449   :  { %v1119_v32 = vsel %vm1118_vm14, %v944_v24, %v1117_v9 }
 0x44a   :  { %v799_v34 = vpop.permute.xlu1 %798  ;;  %v802_v12 = vpop.permute.xlu0 %801  ;;  %v1121_v38 = vsel %vm1120_vm15, %v948_v6, %v1119_v32 }
 0x44b   :  { %v1164_v16 = vsel %vm1163_vm0, %v1121_v38, 0.0  ;;  %v952_v39 = vrot.slane %v799_v34, %v1438_v14  ;;  %v956_v40 = vrot.slane %v802_v12, %v1438_v14 }
 0x44c   :  { %1165 = vadd.xlane.f32.xlu1 %v1164_v16 }
 0x44d   :  { %v1122_v42 = vsel %vm221_vm8, %v956_v40, %v952_v39 }
 0x44e   :  { %v805_v20 = vpop.permute.xlu1 %804  ;;  %v808_v41 = vpop.permute.xlu0 %807 }
 0x44f   :  { %v960_v47 = vrot.slane %v805_v20, %v1438_v14  ;;  %v964_v0 = vrot.slane %v808_v41, %v1438_v14 }
 0x451   :  { %v1123_v43 = vsel %vm1110_vm10, %v960_v47, %v1122_v42 }
 0x452   :  { %v811_v51 = vpop.permute.xlu1 %810  ;;  %v814_v23 = vpop.permute.xlu0 %813  ;;  %v1124_v33 = vsel %vm1112_vm11, %v964_v0, %v1123_v43 }
 0x453   :  { %v968_v26 = vrot.slane %v811_v51, %v1438_v14  ;;  %v972_v53 = vrot.slane %v814_v23, %v1438_v14 }
 0x455   :  { %v1125_v54 = vsel %vm1114_vm12, %v968_v26, %v1124_v33 }
 0x456   :  { %v817_v27 = vpop.permute.xlu1 %816  ;;  %v820_v55 = vpop.permute.xlu0 %819  ;;  %v1126_v57 = vsel %vm1116_vm13, %v972_v53, %v1125_v54 }
 0x457   :  { %v976_v45 = vrot.slane %v817_v27, %v1438_v14  ;;  %v980_v35 = vrot.slane %v820_v55, %v1438_v14 }
 0x459   :  { %v1127_v59 = vsel %vm1118_vm14, %v976_v45, %v1126_v57 }
 0x45a   :  { %v823_v58 = vpop.permute.xlu1 %822  ;;  %v826_v49 = vpop.permute.xlu0 %825  ;;  %v1128_v62 = vsel %vm1120_vm15, %v980_v35, %v1127_v59 }
 0x45b   :  { %v1167_v37 = vsel %vm1163_vm0, %v1128_v62, 0.0  ;;  %v984_v21 = vrot.slane %v823_v58, %v1438_v14  ;;  %v988_v22 = vrot.slane %v826_v49, %v1438_v14 }
 0x45c   :  { %1168 = vadd.xlane.f32.xlu0 %v1167_v37 }
 0x45d   :  { %v1129_v24 = vsel %vm221_vm8, %v988_v22, %v984_v21 }
 0x45e   :  { %v829_v29 = vpop.permute.xlu1 %828  ;;  %v832_v61 = vpop.permute.xlu0 %831 }
 0x45f   :  { %v992_v25 = vrot.slane %v829_v29, %v1438_v14  ;;  %v996_v6 = vrot.slane %v832_v61, %v1438_v14 }
 0x461   :  { %v1130_v34 = vsel %vm1110_vm10, %v992_v25, %v1129_v24 }
 0x462   :  { %v1694_v63 = vpop.permute.xlu1 %834  ;;  %v1696_v1 = vpop.permute.xlu0 %837  ;;  %v1131_v43 = vsel %vm1112_vm11, %v996_v6, %v1130_v34 }
 0x463   :  { %v1000_v51 = vrot.slane %v1694_v63, %v1438_v14  ;;  %v1004_v33 = vrot.slane %v1696_v1, %v1438_v14 }
 0x466   :  { %v1698_v50 = vpop.permute.xlu1 %840  ;;  %v847_v48 = vpop.permute.xlu0 %846 }
 0x467   :  { %v1016_v9 = vrot.slane %v847_v48, %v1438_v14 }
 0x46a   :  { %v850_v4 = vpop.permute.xlu1 %849  ;;  %v871_v31 = vpop.permute.xlu0 %870 }
 0x46b   :  { %v1020_v28 = vrot.slane %v850_v4, %v1438_v14  ;;  %v1048_v41 = vrot.slane %v871_v31, %v1438_v14  ;;  %v1132_v4 = vsel %vm1114_vm12, %v1000_v51, %v1131_v43 }
 0x46d   :  { %v1136_v40 = vsel %vm221_vm8, %v1020_v28, %v1016_v9 }
 0x46e   :  { %v874_v44 = vpop.permute.xlu1 %873  ;;  %v853_v46 = vpop.permute.xlu0 %852 }
 0x46f   :  { %v1024_v30 = vrot.slane %v853_v46, %v1438_v14  ;;  %v1052_v12 = vrot.slane %v874_v44, %v1438_v14 }
 0x471   :  { %v1137_v47 = vsel %vm1110_vm10, %v1024_v30, %v1136_v40  ;;  %v1143_v53 = vsel %vm221_vm8, %v1052_v12, %v1048_v41  ;;  %v1133_v30 = vsel %vm1116_vm13, %v1004_v33, %v1132_v4 }
 0x472   :  { %v877_v5 = vpop.permute.xlu1 %876  ;;  %v895_v7 = vpop.permute.xlu0 %894 }
 0x473   :  { %v1056_v42 = vrot.slane %v877_v5, %v1438_v14  ;;  %v1080_v61 = vrot.slane %v895_v7, %v1438_v14 }
 0x475   :  { %v1144_v49 = vsel %vm1110_vm10, %v1056_v42, %v1143_v53  ;;  %v1199_v42 = vadd.s32 4294967280, %v1434_v13 }
 0x476   :  { %v898_v8 = vpop.permute.xlu1 %897  ;;  %v856_v52 = vpop.permute.xlu0 %855 }
 0x477   :  { %v1028_v32 = vrot.slane %v856_v52, %v1438_v14  ;;  %v1084_v35 = vrot.slane %v898_v8, %v1438_v14  ;;  %v1202_v43 = vsub.s32 %v1199_v42, %v1348_v10 }
 0x479   :  { %v1138_v23 = vsel %vm1112_vm11, %v1028_v32, %v1137_v47  ;;  %v1150_v52 = vsel %vm221_vm8, %v1084_v35, %v1080_v61 }
 0x47a   :  { %v880_v2 = vpop.permute.xlu1 %879  ;;  %v1700_v11 = vpop.permute.xlu0 %900 }
 0x47b   :  { %v1060_v26 = vrot.slane %v880_v2, %v1438_v14  ;;  %v1088_v62 = vrot.slane %v1700_v11, %v1438_v14 }
 0x47d   :  { %v1145_v63 = vsel %vm1112_vm11, %v1060_v26, %v1144_v49  ;;  %v1230_v26 = vadd.s32 4294967272, %v1434_v13 }
 0x47e   :  { %v859_v15 = vpop.permute.xlu1 %858  ;;  %v883_v18 = vpop.permute.xlu0 %882 }
 0x47f   :  { %v1032_v38 = vrot.slane %v859_v15, %v1438_v14  ;;  %v1064_v27 = vrot.slane %v883_v18, %v1438_v14  ;;  %v1008_v15 = vrot.slane %v1698_v50, %v1438_v14  ;;  %v1151_v18 = vsel %vm1110_vm10, %v1088_v62, %v1150_v52 }
 0x481   :  { %v1139_v54 = vsel %vm1114_vm12, %v1032_v38, %v1138_v23  ;;  %v1146_v31 = vsel %vm1114_vm12, %v1064_v27, %v1145_v63  ;;  %v1134_v9 = vsel %vm1118_vm14, %v1008_v15, %v1133_v30 }
 0x482   :  { %v1702_v19 = vpop.permute.xlu1 %903  ;;  %v862_v17 = vpop.permute.xlu0 %861 }
 0x483   :  { %v1036_v20 = vrot.slane %v862_v17, %v1438_v14  ;;  %v1092_v1 = vrot.slane %v1702_v19, %v1438_v14 }
 0x485   :  { %v1140_v57 = vsel %vm1116_vm13, %v1036_v20, %v1139_v54  ;;  %v1152_v21 = vsel %vm1112_vm11, %v1092_v1, %v1151_v18  ;;  %v1192_v20 = vadd.s32 4294967288, %v1434_v13 }
 0x486   :  { %v886_v56 = vpop.permute.xlu1 %885  ;;  %v907_v3 = vpop.permute.xlu0 %906 }
 0x487   :  { %v1068_v59 = vrot.slane %v886_v56, %v1438_v14  ;;  %v1096_v44 = vrot.slane %v907_v3, %v1438_v14 }
 0x489   :  { %v1147_v7 = vsel %vm1116_vm13, %v1068_v59, %v1146_v31  ;;  %v1153_v25 = vsel %vm1114_vm12, %v1096_v44, %v1152_v21 }
 0x48a   :  { %v865_v16 = vpop.permute.xlu1 %864  ;;  %v889_v39 = vpop.permute.xlu0 %888 }
 0x48b   :  { %v1040_v0 = vrot.slane %v865_v16, %v1438_v14  ;;  %v1072_v37 = vrot.slane %v889_v39, %v1438_v14 }
 0x48d   :  { %v1141_v29 = vsel %vm1118_vm14, %v1040_v0, %v1140_v57  ;;  %v1148_v17 = vsel %vm1118_vm14, %v1072_v37, %v1147_v7  ;;  %v1195_v0 = vsub.s32 %v1192_v20, %v1348_v10 }
 0x48e   :  { %v910_v55 = vpop.permute.xlu1 %909  ;;  %v868_v45 = vpop.permute.xlu0 %867 }
 0x48f   :  { %v1044_v58 = vrot.slane %v868_v45, %v1438_v14  ;;  %v1100_v2 = vrot.slane %v910_v55, %v1438_v14  ;;  %v1233_v55 = vsub.s32 %v1230_v26, %v1348_v10 }
 0x491   :  { %v1142_v48 = vsel %vm1120_vm15, %v1044_v58, %v1141_v29  ;;  %v1154_v50 = vsel %vm1116_vm13, %v1100_v2, %v1153_v25 }
 0x492   :  { %v892_v46 = vpop.permute.xlu1 %891  ;;  %v913_v5 = vpop.permute.xlu0 %912  ;;  %v1173_v8 = vsel %vm1163_vm0, %v1142_v48, 0.0 }
 0x493   :  { %v1076_v11 = vrot.slane %v892_v46, %v1438_v14  ;;  %1174 = vadd.xlane.f32.xlu0 %v1173_v8  ;;  %v1104_v19 = vrot.slane %v913_v5, %v1438_v14 }
 0x495   :  { %v1149_v22 = vsel %vm1120_vm15, %v1076_v11, %v1148_v17  ;;  %v1155_v32 = vsel %vm1118_vm14, %v1104_v19, %v1154_v50 }
 0x496   :  { %v844_v56 = vpop.permute.xlu1 %843  ;;  %v916_v3 = vpop.permute.xlu0 %915  ;;  %v1176_v28 = vsel %vm1163_vm0, %v1149_v22, 0.0 }
 0x497   :  { %v1012_v24 = vrot.slane %v844_v56, %v1438_v14  ;;  %v1108_v6 = vrot.slane %v916_v3, %v1438_v14  ;;  %1177 = vadd.xlane.f32.xlu0 %v1176_v28 }
 0x499   :  { %v1135_v34 = vsel %vm1120_vm15, %v1012_v24, %v1134_v9  ;;  %v1156_v12 = vsel %vm1120_vm15, %v1108_v6, %v1155_v32 }
 0x49a   :  { %v1170_v38 = vsel %vm1163_vm0, %v1135_v34, 0.0  ;;  %v1179_v16 = vsel %vm1163_vm0, %v1156_v12, 0.0 }
 0x49b   :  { %1171 = vadd.xlane.f32.xlu1 %v1170_v38  ;;  %1180 = vadd.xlane.f32.xlu0 %v1179_v16 }
 0x4ac   :  { %1225 = vperm.xlu1 %1287, %v1581_v60  }
 0x4b1   :  { %1228 = vperm.xlu0 %1286, %v1616_v36  }
 0x4d9   :  { %v1166_v41 = vpop.xlane.xlu1 %1165 }
 0x4da   :  { %v1191_v54 = vrot.slane %v1166_v41, %v1438_v14 }
 0x4e9   :  { %v1169_v39 = vpop.xlane.xlu0 %1168 }
 0x4ea   :  { %v1196_v33 = vrot.slane %v1169_v39, %v1195_v0 }
 0x4ec   :  { %v1198_v35 = vsel %vm1197_vm1, %v1196_v33, %v1191_v54 }
 0x520   :  { %v1175_v40 = vpop.xlane.xlu0 %1174 }
 0x521   :  { %v1209_v27 = vrot.slane %v1175_v40, %v1438_v14 }
 0x524   :  { %v1178_v47 = vpop.xlane.xlu0 %1177 }
 0x525   :  { %v1213_v60 = vrot.slane %v1178_v47, %v1195_v0 }
 0x527   :  { %v1214_v57 = vsel %vm1197_vm1, %v1213_v60, %v1209_v27 }
 0x528   :  { %v1172_v51 = vpop.xlane.xlu1 %1171  ;;  %v1181_v23 = vpop.xlane.xlu0 %1180 }
 0x529   :  { %v1203_v36 = vrot.slane %v1172_v51, %v1202_v43  ;;  %v1218_v53 = vrot.slane %v1181_v23, %v1202_v43 }
 0x52b   :  { %v1205_v59 = vsel %vm1204_vm2, %v1203_v36, %v1198_v35  ;;  %v1219_v58 = vsel %vm1204_vm2, %v1218_v53, %v1214_v57 }
 0x52c   :  { %v1226_v45 = vpop.permute.xlu1 %1225  ;;  %v1220_v37 = vsel %vm221_vm8, %v1219_v58, %v1205_v59 }
 0x52d   :  { %v1234_v62 = vrot.slane %v1226_v45, %v1233_v55 }
 0x530   :  { %v1229_v49 = vpop.permute.xlu0 %1228 }
 0x531   :  { %v1238_v13 = vrot.slane %v1229_v49, %v1233_v55 }
 0x533   :  { %v1239_v29 = vsel %vm221_vm8, %v1238_v13, %v1234_v62 }
 0x534   :  { %v1242_v61 = vsel %vm1241_vm3, %v1220_v37, %v1239_v29 }
 0x535   :  { %1244 = vst.msk [vmem:[%s1793_s5] sm:$0x3] %vm1243_vm4, %v1242_v61 }

</bundles_post_ra>
